<compile_context>
chip_gen: v5e
topology: v5e:2x2
jax: 0.10.0
libtpu: 0.0.40
codegen_flags: <defaults>
</compile_context>

<pallas_src>
import jax
import jax.numpy as jnp
from jax.experimental import pallas as pl
from jax.experimental.pallas import tpu as pltpu

# ----------------------------- config ---------------------------------------
OBS_N = 16
N_GUESSES = 8
ATT_HIDDEN = 16
HIDDEN = 32
ACT_N = 32
L = 8
B = 2
FUSED1 = ATT_HIDDEN + HIDDEN  # fused layer-1 output width


# ----------------------------- kernel ---------------------------------------
def drqn_attention_kernel(
    # inputs (all full-array VMEM blocks, single grid step)
    x_ref,       # (L*B, OBS_N)
    p_ref,       # (L*B, L*B)   prefix-sum matrix  tril(L) (x) I_B
    w1_ref,      # (OBS_N, FUSED1)   fused attention/encoder layer-1 weight
    b1_ref,      # (1, FUSED1)       fused layer-1 bias (position folded in)
    wa2_ref,     # (FUSED1, 1)       attention layer-2 weight (zero-padded rows)
    ba2_ref,     # (1, 1)
    we2_ref,     # (FUSED1, HIDDEN)  encoder layer-2 weight (zero-padded rows)
    be2_ref,     # (1, HIDDEN)
    wq12_ref,    # (2, HIDDEN, HIDDEN)  stacked Q linear1 / linear2 weights
    bq12_ref,    # (2, 1, HIDDEN)
    wq3_ref,     # (HIDDEN, ACT_N)
    bq3_ref,     # (1, ACT_N)
    # outputs
    action_ref,      # (L*B, ACT_N)
    hidden_out_ref,  # (B, HIDDEN)
):
    x = x_ref[...]  # (LB, OBS_N)

    # Fused layer 1 (attention_head[0] + encoder[0]): Linear -> ReLU
    y1 = jnp.maximum(
        jnp.dot(x, w1_ref[...], preferred_element_type=jnp.float32)
        + b1_ref[...], 0.0)                                        # (LB, FUSED1)

    # attention_head layer 2: Linear -> Sigmoid   => (LB, 1)
    att = jax.nn.sigmoid(
        jnp.dot(y1, wa2_ref[...], preferred_element_type=jnp.float32)
        + ba2_ref[...])

    # encoder layer 2: Linear                      => (LB, HIDDEN)
    enc = jnp.dot(y1, we2_ref[...], preferred_element_type=jnp.float32) \
        + be2_ref[...]

    weighted = enc * att                                           # (LB, HIDDEN)

    # Prefix sum over L (per batch element) via one small matmul.
    hiddens = jnp.dot(p_ref[...], weighted,
                      preferred_element_type=jnp.float32)          # (LB, HIDDEN)

    # Q head applied once to the stacked hiddens.
    q = jnp.maximum(
        jnp.dot(hiddens, wq12_ref[0], preferred_element_type=jnp.float32)
        + bq12_ref[0], 0.0)
    q = jnp.maximum(
        jnp.dot(q, wq12_ref[1], preferred_element_type=jnp.float32)
        + bq12_ref[1], 0.0)
    q = jnp.dot(q, wq3_ref[...], preferred_element_type=jnp.float32) \
        + bq3_ref[...]                                             # (LB, ACT_N)

    action_ref[...] = q.astype(action_ref.dtype)
    # final hidden = last timestep's rows (l = L-1, all b)
    lb, bsz = hidden_out_ref.shape[0], hidden_out_ref.shape[0]
    del lb, bsz
    hidden_out_ref[...] = hiddens[hiddens.shape[0] - hidden_out_ref.shape[0]:, :] \
        .astype(hidden_out_ref.dtype)


# ----------------------------- wrapper ---------------------------------------
def _full_spec(shape):
    zeros = (0,) * len(shape)
    return pl.BlockSpec(shape, lambda i, _z=zeros: _z)


@jax.jit
def drqn_forward(x, params):
    """x: (L, B, OBS_N) float32. Returns (action (L,B,ACT_N), hidden_out (B,HIDDEN))."""
    Lx, Bx, N = x.shape
    assert N == OBS_N
    LB = Lx * Bx

    (wa1, ba1, wa2, ba2, we1, be1, we2, be2,
     wq1, bq1, wq2, bq2, wq3, bq3) = params

    # Fold the constant one-hot position (hidden=None -> l_0 = 0) into the
    # layer-1 biases; keep only the OBS_N rows of the layer-1 weights.
    ba1_eff = ba1 + wa1[OBS_N:OBS_N + 1, :]
    be1_eff = be1 + we1[OBS_N:OBS_N + 1, :]

    # Fuse the two layer-1 projections (shared LHS).
    w1 = jnp.concatenate([wa1[:OBS_N, :], we1[:OBS_N, :]], axis=1)   # (OBS_N, FUSED1)
    b1 = jnp.concatenate([ba1_eff, be1_eff], axis=1)                 # (1, FUSED1)

    # Zero-pad layer-2 weights so they consume the fused FUSED1-wide activation
    # directly (no value slicing inside the kernel).
    wa2p = jnp.concatenate([wa2, jnp.zeros((HIDDEN, 1), wa2.dtype)], axis=0)           # (FUSED1, 1)
    we2p = jnp.concatenate([jnp.zeros((ATT_HIDDEN, HIDDEN), we2.dtype), we2], axis=0)  # (FUSED1, HIDDEN)

    # Stack Q-head layer1/layer2 params (same shapes) to cut DMA descriptors.
    wq12 = jnp.stack([wq1, wq2])   # (2, HIDDEN, HIDDEN)
    bq12 = jnp.stack([bq1, bq2])   # (2, 1, HIDDEN)

    # Prefix-sum matrix: hidden_{l,b} = sum_{k<=l} weighted_{k,b}
    prefix = jnp.kron(jnp.tril(jnp.ones((Lx, Lx), jnp.float32)),
                      jnp.eye(Bx, dtype=jnp.float32))                # (LB, LB)

    x2 = x.reshape(LB, N)

    inputs = (x2, prefix, w1, b1, wa2p, ba2, we2p, be2, wq12, bq12, wq3, bq3)
    in_specs = [_full_spec(a.shape) for a in inputs]
    out_specs = [
        pl.BlockSpec((LB, ACT_N), lambda i: (0, 0)),
        pl.BlockSpec((Bx, HIDDEN), lambda i: (0, 0)),
    ]

    action2, hidden_out = pl.pallas_call(
        drqn_attention_kernel,
        out_shape=(
            jax.ShapeDtypeStruct((LB, ACT_N), jnp.float32),
            jax.ShapeDtypeStruct((Bx, HIDDEN), jnp.float32),
        ),
        grid_spec=pltpu.PrefetchScalarGridSpec(
            num_scalar_prefetch=0,
            grid=(1,),
            in_specs=in_specs,
            out_specs=out_specs,
        ),
        compiler_params=pltpu.CompilerParams(
            dimension_semantics=("arbitrary",)),
    )(*inputs)

    return action2.reshape(Lx, Bx, ACT_N), hidden_out


# ----------------------------- params + reference -----------------------------
D_IN = OBS_N + N_GUESSES


def init_params(key):
    ks = jax.random.split(key, 14)
    scale = 0.1

    def w(k, shape):
        return (scale * jax.random.normal(k, shape)).astype(jnp.float32)

    wa1 = w(ks[0], (D_IN, ATT_HIDDEN)); ba1 = w(ks[1], (1, ATT_HIDDEN))
    wa2 = w(ks[2], (ATT_HIDDEN, 1));    ba2 = w(ks[3], (1, 1))
    we1 = w(ks[4], (D_IN, HIDDEN));     be1 = w(ks[5], (1, HIDDEN))
    we2 = w(ks[6], (HIDDEN, HIDDEN));   be2 = w(ks[7], (1, HIDDEN))
    wq1 = w(ks[8], (HIDDEN, HIDDEN));   bq1 = w(ks[9], (1, HIDDEN))
    wq2 = w(ks[10], (HIDDEN, HIDDEN));  bq2 = w(ks[11], (1, HIDDEN))
    wq3 = w(ks[12], (HIDDEN, ACT_N));   bq3 = w(ks[13], (1, ACT_N))
    return (wa1, ba1, wa2, ba2, we1, be1, we2, be2,
            wq1, bq1, wq2, bq2, wq3, bq3)


def drqn_forward_ref(x, params):
    """Pure-JAX reference mirroring the PyTorch forward (attention/onehot)."""
    (wa1, ba1, wa2, ba2, we1, be1, we2, be2,
     wq1, bq1, wq2, bq2, wq3, bq3) = params
    Lx, Bx, N = x.shape
    position = jnp.zeros((Bx, N_GUESSES), x.dtype).at[:, 0].set(1.0)
    hidden = jnp.zeros((Bx, HIDDEN), jnp.float32)
    outs = []
    for l in range(Lx):
        init = jnp.concatenate([x[l], position], axis=1)
        att = jax.nn.sigmoid(jnp.maximum(init @ wa1 + ba1, 0.0) @ wa2 + ba2)
        enc = jnp.maximum(init @ we1 + be1, 0.0) @ we2 + be2
        hidden = hidden + enc * att
        outs.append(hidden)
    out = jnp.stack(outs).reshape(Lx * Bx, HIDDEN)
    q = jnp.maximum(out @ wq1 + bq1, 0.0)
    q = jnp.maximum(q @ wq2 + bq2, 0.0)
    q = q @ wq3 + bq3
    return q.reshape(Lx, Bx, ACT_N), hidden


# ----------------------------- main ------------------------------------------
if __name__ == "__main__":
    key = jax.random.PRNGKey(0)
    kx, kp = jax.random.split(key)
    x = jax.random.normal(kx, (L, B, OBS_N), dtype=jnp.float32)
    params = init_params(kp)

    action, hidden_out = drqn_forward(x, params)
    jax.block_until_ready((action, hidden_out))

    action_ref, hidden_ref = drqn_forward_ref(x, params)
    assert action.shape == (L, B, ACT_N)
    assert hidden_out.shape == (B, HIDDEN)
    assert jnp.allclose(action, action_ref, atol=1e-5, rtol=1e-5)
    assert jnp.allclose(hidden_out, hidden_ref, atol=1e-5, rtol=1e-5)

    print("KERNEL_OK")
</pallas_src>

<mosaic_0001>
module attributes {stable_mosaic.version = 11 : i64} {
  func.func @drqn_attention_kernel(%arg0: i32, %arg1: memref<16x16xf32, #tpu.memory_space<vmem>>, %arg2: memref<16x16xf32, #tpu.memory_space<vmem>>, %arg3: memref<16x48xf32, #tpu.memory_space<vmem>>, %arg4: memref<1x48xf32, #tpu.memory_space<vmem>>, %arg5: memref<48x1xf32, #tpu.memory_space<vmem>>, %arg6: memref<1x1xf32, #tpu.memory_space<vmem>>, %arg7: memref<48x32xf32, #tpu.memory_space<vmem>>, %arg8: memref<1x32xf32, #tpu.memory_space<vmem>>, %arg9: memref<2x32x32xf32, #tpu.memory_space<vmem>>, %arg10: memref<2x1x32xf32, #tpu.memory_space<vmem>>, %arg11: memref<32x32xf32, #tpu.memory_space<vmem>>, %arg12: memref<1x32xf32, #tpu.memory_space<vmem>>, %arg13: memref<16x32xf32, #tpu.memory_space<vmem>>, %arg14: memref<2x32xf32, #tpu.memory_space<vmem>>) attributes {dimension_semantics = [#tpu.dimension_semantics<arbitrary>], iteration_bounds = array<i64: 1>, scalar_prefetch = 0 : i64, scratch_operands = 0 : i64, tpu.core_type = #tpu.core_type<tc>, window_params = [{pipeline_mode = #tpu.pipeline_mode<synchronous>, transform_indices = @transform_0, window_bounds = array<i64: 16, 16>}, {pipeline_mode = #tpu.pipeline_mode<synchronous>, transform_indices = @transform_1, window_bounds = array<i64: 16, 16>}, {pipeline_mode = #tpu.pipeline_mode<synchronous>, transform_indices = @transform_2, window_bounds = array<i64: 16, 48>}, {pipeline_mode = #tpu.pipeline_mode<synchronous>, transform_indices = @transform_3, window_bounds = array<i64: 1, 48>}, {pipeline_mode = #tpu.pipeline_mode<synchronous>, transform_indices = @transform_4, window_bounds = array<i64: 48, 1>}, {pipeline_mode = #tpu.pipeline_mode<synchronous>, transform_indices = @transform_5, window_bounds = array<i64: 1, 1>}, {pipeline_mode = #tpu.pipeline_mode<synchronous>, transform_indices = @transform_6, window_bounds = array<i64: 48, 32>}, {pipeline_mode = #tpu.pipeline_mode<synchronous>, transform_indices = @transform_7, window_bounds = array<i64: 1, 32>}, {pipeline_mode = #tpu.pipeline_mode<synchronous>, transform_indices = @transform_8, window_bounds = array<i64: 2, 32, 32>}, {pipeline_mode = #tpu.pipeline_mode<synchronous>, transform_indices = @transform_9, window_bounds = array<i64: 2, 1, 32>}, {pipeline_mode = #tpu.pipeline_mode<synchronous>, transform_indices = @transform_10, window_bounds = array<i64: 32, 32>}, {pipeline_mode = #tpu.pipeline_mode<synchronous>, transform_indices = @transform_11, window_bounds = array<i64: 1, 32>}, {pipeline_mode = #tpu.pipeline_mode<synchronous>, transform_indices = @transform_12, window_bounds = array<i64: 16, 32>}, {pipeline_mode = #tpu.pipeline_mode<synchronous>, transform_indices = @transform_13, window_bounds = array<i64: 2, 32>}]} {
    %c0 = arith.constant 0 : index
    %c0_0 = arith.constant 0 : index
    %0 = vector.load %arg1[%c0, %c0_0] : memref<16x16xf32, #tpu.memory_space<vmem>>, vector<16x16xf32>
    %c0_1 = arith.constant 0 : index
    %c0_2 = arith.constant 0 : index
    %1 = vector.load %arg3[%c0_1, %c0_2] : memref<16x48xf32, #tpu.memory_space<vmem>>, vector<16x48xf32>
    %cst = arith.constant dense<0.000000e+00> : vector<16x48xf32>
    %2 = tpu.matmul %0, %1, %cst {dimension_numbers = #tpu.dot_dimension_numbers<[1], [0], [0], [1], [0, 0, 1, 1], [], []>} : vector<16x16xf32>, vector<16x48xf32>, vector<16x48xf32> -> vector<16x48xf32>
    %c0_3 = arith.constant 0 : index
    %c0_4 = arith.constant 0 : index
    %3 = vector.load %arg4[%c0_3, %c0_4] : memref<1x48xf32, #tpu.memory_space<vmem>>, vector<1x48xf32>
    %4 = vector.broadcast %3 : vector<1x48xf32> to vector<16x48xf32>
    %5 = arith.addf %2, %4 : vector<16x48xf32>
    %cst_5 = arith.constant 0.000000e+00 : f32
    %6 = vector.broadcast %cst_5 : f32 to vector<16x48xf32>
    %7 = arith.maximumf %5, %6 : vector<16x48xf32>
    %c0_6 = arith.constant 0 : index
    %c0_7 = arith.constant 0 : index
    %8 = vector.load %arg5[%c0_6, %c0_7] : memref<48x1xf32, #tpu.memory_space<vmem>>, vector<48x1xf32>
    %cst_8 = arith.constant dense<0.000000e+00> : vector<16x1xf32>
    %9 = tpu.matmul %7, %8, %cst_8 {dimension_numbers = #tpu.dot_dimension_numbers<[1], [0], [0], [1], [0, 0, 1, 1], [], []>} : vector<16x48xf32>, vector<48x1xf32>, vector<16x1xf32> -> vector<16x1xf32>
    %c0_9 = arith.constant 0 : index
    %c0_10 = arith.constant 0 : index
    %10 = vector.load %arg6[%c0_9, %c0_10] : memref<1x1xf32, #tpu.memory_space<vmem>>, vector<1x1xf32>
    %11 = vector.broadcast %10 : vector<1x1xf32> to vector<16x1xf32>
    %12 = arith.addf %9, %11 : vector<16x1xf32>
    %13 = arith.negf %12 : vector<16x1xf32>
    %14 = math.exp %13 : vector<16x1xf32>
    %cst_11 = arith.constant 1.000000e+00 : f32
    %15 = vector.broadcast %cst_11 : f32 to vector<16x1xf32>
    %16 = arith.addf %15, %14 : vector<16x1xf32>
    %17 = arith.divf %15, %16 : vector<16x1xf32>
    %c0_12 = arith.constant 0 : index
    %c0_13 = arith.constant 0 : index
    %18 = vector.load %arg7[%c0_12, %c0_13] : memref<48x32xf32, #tpu.memory_space<vmem>>, vector<48x32xf32>
    %cst_14 = arith.constant dense<0.000000e+00> : vector<16x32xf32>
    %19 = tpu.matmul %7, %18, %cst_14 {dimension_numbers = #tpu.dot_dimension_numbers<[1], [0], [0], [1], [0, 0, 1, 1], [], []>} : vector<16x48xf32>, vector<48x32xf32>, vector<16x32xf32> -> vector<16x32xf32>
    %c0_15 = arith.constant 0 : index
    %c0_16 = arith.constant 0 : index
    %20 = vector.load %arg8[%c0_15, %c0_16] : memref<1x32xf32, #tpu.memory_space<vmem>>, vector<1x32xf32>
    %21 = vector.broadcast %20 : vector<1x32xf32> to vector<16x32xf32>
    %22 = arith.addf %19, %21 : vector<16x32xf32>
    %23 = vector.broadcast %17 : vector<16x1xf32> to vector<16x32xf32>
    %24 = arith.mulf %22, %23 : vector<16x32xf32>
    %c0_17 = arith.constant 0 : index
    %c0_18 = arith.constant 0 : index
    %25 = vector.load %arg2[%c0_17, %c0_18] : memref<16x16xf32, #tpu.memory_space<vmem>>, vector<16x16xf32>
    %cst_19 = arith.constant dense<0.000000e+00> : vector<16x32xf32>
    %26 = tpu.matmul %25, %24, %cst_19 {dimension_numbers = #tpu.dot_dimension_numbers<[1], [0], [0], [1], [0, 0, 1, 1], [], []>} : vector<16x16xf32>, vector<16x32xf32>, vector<16x32xf32> -> vector<16x32xf32>
    %c0_20 = arith.constant 0 : index
    %c0_21 = arith.constant 0 : index
    %c0_22 = arith.constant 0 : index
    %27 = vector.load %arg9[%c0_20, %c0_21, %c0_22] : memref<2x32x32xf32, #tpu.memory_space<vmem>>, vector<1x32x32xf32>
    %28 = vector.shape_cast %27 : vector<1x32x32xf32> to vector<32x32xf32>
    %cst_23 = arith.constant dense<0.000000e+00> : vector<16x32xf32>
    %29 = tpu.matmul %26, %28, %cst_23 {dimension_numbers = #tpu.dot_dimension_numbers<[1], [0], [0], [1], [0, 0, 1, 1], [], []>} : vector<16x32xf32>, vector<32x32xf32>, vector<16x32xf32> -> vector<16x32xf32>
    %c0_24 = arith.constant 0 : index
    %c0_25 = arith.constant 0 : index
    %c0_26 = arith.constant 0 : index
    %30 = vector.load %arg10[%c0_24, %c0_25, %c0_26] : memref<2x1x32xf32, #tpu.memory_space<vmem>>, vector<1x1x32xf32>
    %31 = vector.shape_cast %30 : vector<1x1x32xf32> to vector<1x32xf32>
    %32 = vector.broadcast %31 : vector<1x32xf32> to vector<16x32xf32>
    %33 = arith.addf %29, %32 : vector<16x32xf32>
    %cst_27 = arith.constant 0.000000e+00 : f32
    %34 = vector.broadcast %cst_27 : f32 to vector<16x32xf32>
    %35 = arith.maximumf %33, %34 : vector<16x32xf32>
    %c1 = arith.constant 1 : index
    %c0_28 = arith.constant 0 : index
    %c0_29 = arith.constant 0 : index
    %36 = vector.load %arg9[%c1, %c0_28, %c0_29] : memref<2x32x32xf32, #tpu.memory_space<vmem>>, vector<1x32x32xf32>
    %37 = vector.shape_cast %36 : vector<1x32x32xf32> to vector<32x32xf32>
    %cst_30 = arith.constant dense<0.000000e+00> : vector<16x32xf32>
    %38 = tpu.matmul %35, %37, %cst_30 {dimension_numbers = #tpu.dot_dimension_numbers<[1], [0], [0], [1], [0, 0, 1, 1], [], []>} : vector<16x32xf32>, vector<32x32xf32>, vector<16x32xf32> -> vector<16x32xf32>
    %c1_31 = arith.constant 1 : index
    %c0_32 = arith.constant 0 : index
    %c0_33 = arith.constant 0 : index
    %39 = vector.load %arg10[%c1_31, %c0_32, %c0_33] : memref<2x1x32xf32, #tpu.memory_space<vmem>>, vector<1x1x32xf32>
    %40 = vector.shape_cast %39 : vector<1x1x32xf32> to vector<1x32xf32>
    %41 = vector.broadcast %40 : vector<1x32xf32> to vector<16x32xf32>
    %42 = arith.addf %38, %41 : vector<16x32xf32>
    %cst_34 = arith.constant 0.000000e+00 : f32
    %43 = vector.broadcast %cst_34 : f32 to vector<16x32xf32>
    %44 = arith.maximumf %42, %43 : vector<16x32xf32>
    %c0_35 = arith.constant 0 : index
    %c0_36 = arith.constant 0 : index
    %45 = vector.load %arg11[%c0_35, %c0_36] : memref<32x32xf32, #tpu.memory_space<vmem>>, vector<32x32xf32>
    %cst_37 = arith.constant dense<0.000000e+00> : vector<16x32xf32>
    %46 = tpu.matmul %44, %45, %cst_37 {dimension_numbers = #tpu.dot_dimension_numbers<[1], [0], [0], [1], [0, 0, 1, 1], [], []>} : vector<16x32xf32>, vector<32x32xf32>, vector<16x32xf32> -> vector<16x32xf32>
    %c0_38 = arith.constant 0 : index
    %c0_39 = arith.constant 0 : index
    %47 = vector.load %arg12[%c0_38, %c0_39] : memref<1x32xf32, #tpu.memory_space<vmem>>, vector<1x32xf32>
    %48 = vector.broadcast %47 : vector<1x32xf32> to vector<16x32xf32>
    %49 = arith.addf %46, %48 : vector<16x32xf32>
    %c0_40 = arith.constant 0 : index
    %c0_41 = arith.constant 0 : index
    %50 = vector.load %arg13[%c0_40, %c0_41] : memref<16x32xf32, #tpu.memory_space<vmem>>, vector<16x32xf32>
    tpu.vector_store %arg13[%c0_40, %c0_41], %49 {strides = array<i32>} : memref<16x32xf32, #tpu.memory_space<vmem>>, vector<16x32xf32>,
    %51 = vector.extract_strided_slice %26 {offsets = [14, 0], sizes = [2, 32], strides = [1, 1]} : vector<16x32xf32> to vector<2x32xf32>
    %c0_42 = arith.constant 0 : index
    %c0_43 = arith.constant 0 : index
    %52 = vector.load %arg14[%c0_42, %c0_43] : memref<2x32xf32, #tpu.memory_space<vmem>>, vector<2x32xf32>
    tpu.vector_store %arg14[%c0_42, %c0_43], %51 {strides = array<i32>} : memref<2x32xf32, #tpu.memory_space<vmem>>, vector<2x32xf32>,
    return
  }
  func.func @transform_0(%arg0: i32) -> (i32, i32) {
    %c0_i32 = arith.constant 0 : i32
    %c0_i32_0 = arith.constant 0 : i32
    %c0_i32_1 = arith.constant 0 : i32
    return %c0_i32, %c0_i32_0 : i32, i32
  }
  func.func @transform_1(%arg0: i32) -> (i32, i32) {
    %c0_i32 = arith.constant 0 : i32
    %c0_i32_0 = arith.constant 0 : i32
    %c0_i32_1 = arith.constant 0 : i32
    return %c0_i32, %c0_i32_0 : i32, i32
  }
  func.func @transform_2(%arg0: i32) -> (i32, i32) {
    %c0_i32 = arith.constant 0 : i32
    %c0_i32_0 = arith.constant 0 : i32
    %c0_i32_1 = arith.constant 0 : i32
    return %c0_i32, %c0_i32_0 : i32, i32
  }
  func.func @transform_3(%arg0: i32) -> (i32, i32) {
    %c0_i32 = arith.constant 0 : i32
    %c0_i32_0 = arith.constant 0 : i32
    %c0_i32_1 = arith.constant 0 : i32
    return %c0_i32, %c0_i32_0 : i32, i32
  }
  func.func @transform_4(%arg0: i32) -> (i32, i32) {
    %c0_i32 = arith.constant 0 : i32
    %c0_i32_0 = arith.constant 0 : i32
    %c0_i32_1 = arith.constant 0 : i32
    return %c0_i32, %c0_i32_0 : i32, i32
  }
  func.func @transform_5(%arg0: i32) -> (i32, i32) {
    %c0_i32 = arith.constant 0 : i32
    %c0_i32_0 = arith.constant 0 : i32
    %c0_i32_1 = arith.constant 0 : i32
    return %c0_i32, %c0_i32_0 : i32, i32
  }
  func.func @transform_6(%arg0: i32) -> (i32, i32) {
    %c0_i32 = arith.constant 0 : i32
    %c0_i32_0 = arith.constant 0 : i32
    %c0_i32_1 = arith.constant 0 : i32
    return %c0_i32, %c0_i32_0 : i32, i32
  }
  func.func @transform_7(%arg0: i32) -> (i32, i32) {
    %c0_i32 = arith.constant 0 : i32
    %c0_i32_0 = arith.constant 0 : i32
    %c0_i32_1 = arith.constant 0 : i32
    return %c0_i32, %c0_i32_0 : i32, i32
  }
  func.func @transform_8(%arg0: i32) -> (i32, i32, i32) {
    %c0_i32 = arith.constant 0 : i32
    %c0_i32_0 = arith.constant 0 : i32
    %c0_i32_1 = arith.constant 0 : i32
    %c0_i32_2 = arith.constant 0 : i32
    return %c0_i32, %c0_i32_0, %c0_i32_1 : i32, i32, i32
  }
  func.func @transform_9(%arg0: i32) -> (i32, i32, i32) {
    %c0_i32 = arith.constant 0 : i32
    %c0_i32_0 = arith.constant 0 : i32
    %c0_i32_1 = arith.constant 0 : i32
    %c0_i32_2 = arith.constant 0 : i32
    return %c0_i32, %c0_i32_0, %c0_i32_1 : i32, i32, i32
  }
  func.func @transform_10(%arg0: i32) -> (i32, i32) {
    %c0_i32 = arith.constant 0 : i32
    %c0_i32_0 = arith.constant 0 : i32
    %c0_i32_1 = arith.constant 0 : i32
    return %c0_i32, %c0_i32_0 : i32, i32
  }
  func.func @transform_11(%arg0: i32) -> (i32, i32) {
    %c0_i32 = arith.constant 0 : i32
    %c0_i32_0 = arith.constant 0 : i32
    %c0_i32_1 = arith.constant 0 : i32
    return %c0_i32, %c0_i32_0 : i32, i32
  }
  func.func @transform_12(%arg0: i32) -> (i32, i32) {
    %c0_i32 = arith.constant 0 : i32
    %c0_i32_0 = arith.constant 0 : i32
    %c0_i32_1 = arith.constant 0 : i32
    return %c0_i32, %c0_i32_0 : i32, i32
  }
  func.func @transform_13(%arg0: i32) -> (i32, i32) {
    %c0_i32 = arith.constant 0 : i32
    %c0_i32_0 = arith.constant 0 : i32
    %c0_i32_1 = arith.constant 0 : i32
    return %c0_i32, %c0_i32_0 : i32, i32
  }
}

</mosaic_0001>

<bundles_post_ra>
// kernel: drqn_forward.1
= control target key start
LH: loop header
LB: loop body
LE: loop exit
PB: predicated region body
PF: predicated region fallthrough
CT: control target
= control target key end

     0   :  { %s695_s0 = inlined_call_operand.vmem [shape: f32[16,16], index: 0, kind: input, shape index: {}]   ;;  %s696_s1 = inlined_call_operand.vmem [shape: f32[16,16], index: 1, kind: input, shape index: {}]   ;;  %s697_s2 = inlined_call_operand.vmem [shape: f32[16,48], index: 2, kind: input, shape index: {}]   ;;  %s698_s3 = inlined_call_operand.vmem [shape: f32[1,48], index: 3, kind: input, shape index: {}]   ;;  %s699_s4 = inlined_call_operand.vmem [shape: f32[48,1], index: 4, kind: input, shape index: {}]   ;;  %s700_s5 = inlined_call_operand.<no memory space> [shape: f32[1,1], index: 5, kind: input, shape index: {}]   ;;  %s701_s6 = inlined_call_operand.vmem [shape: f32[48,32], index: 6, kind: input, shape index: {}]   ;;  %s702_s7 = inlined_call_operand.vmem [shape: f32[1,32], index: 7, kind: input, shape index: {}]   ;;  %s703_s8 = inlined_call_operand.vmem [shape: f32[2,32,32], index: 8, kind: input, shape index: {}]   ;;  %s704_s9 = inlined_call_operand.vmem [shape: f32[2,1,32], index: 9, kind: input, shape index: {}]   ;;  %s705_s10 = inlined_call_operand.vmem [shape: f32[32,32], index: 10, kind: input, shape index: {}]   ;;  %s706_s11 = inlined_call_operand.vmem [shape: f32[1,32], index: 11, kind: input, shape index: {}]   ;;  %s707_s12 = inlined_call_operand.hbm [shape: f32[16,32], index: 12, kind: output, shape index: {0}]   ;;  %s708_s13 = inlined_call_operand.hbm [shape: f32[2,32], index: 13, kind: output, shape index: {1}]  }
   0x1   :  { %v19_v0 = vstv %s700_s5 }
   0x2   :  { %20 = vst [vmem:[#allocation2] sm:$0x1] %v19_v0 }
   0x3   :  { %21 = vsyncpa [#allocation4], 0  ;;  %v50_v1 = vld [vmem:[%s697_s2 + $0x8] sm:$0xff]  ;;  %v49_v2 = vld [vmem:[%s697_s2] sm:$0xff]  ;;  %vm55_vm0 = vcmask 130048  }
   0x4   :  { %76 = vmatpush.msra.mxu0 %v50_v1  ;;  %v47_v3 = vld [vmem:[%s695_s0] sm:$0xff]  ;;  %v92_v4 = vld [vmem:[%s699_s4 + $0x28] sm:$0xff]  ;;  %v90_v8 = vld [vmem:[%s699_s4 + $0x18] sm:$0xff] }
   0x5   :  { %v170_v5 = vld [vmem:[%s701_s6 + $0x28] sm:$0xff]  ;;  %114 = vmatpush.msra.mxu1 %v92_v4  ;;  %v91_v6 = vld [vmem:[%s699_s4 + $0x20] sm:$0xff]  ;;  %v168_v9 = vld [vmem:[%s701_s6 + $0x18] sm:$0xff] }
   0x6   :  { %185 = vmatpush.msra.mxu2 %v170_v5  ;;  %v169_v7 = vld [vmem:[%s701_s6 + $0x20] sm:$0xff]  ;;  %77 = vmatpush.msra.mxu0 %v49_v2 }
   0x7   :  { %397 = vmatmul.msk.f32.vlgmr.msra.gmra.mxu0 %vm55_vm0, %v47_v3  ;;  %115 = vmatpush.msra.mxu1 %v91_v6 }
   0x8   :  { %186 = vmatpush.msra.mxu2 %v169_v7 }
   0x9   :  { %22 = vsyncpa [#allocation6], 0  ;;  %116 = vmatpush.msra.mxu1 %v90_v8  ;;  %v48_v10 = vld [vmem:[%s695_s0 + $0x8] sm:$0xff]  ;;  %v89_v11 = vld [vmem:[%s699_s4 + $0x10] sm:$0xff]  ;;  %vm97_vm1 = vcmask 392192   ;;  %v494_v24 = vmov 0  }
   0xa   :  { %187 = vmatpush.msra.mxu2 %v168_v9  ;;  %v167_v12 = vld [vmem:[%s701_s6 + $0x10] sm:$0xff]  ;;  %v88_v13 = vld [vmem:[%s699_s4 + $0x8] sm:$0xff]  ;;  %v87_v15 = vld [vmem:[%s699_s4] sm:$0xff]  ;;  %427 = vset.pattern.permute.xlu0 %v494_v24  ;;  %vm249_vm10 = vcmask 261120   ;;  %vm361_vm11 = vcmask 261126   ;;  %s495_s27 = smov [#allocation5]  }
   0xb   :  { %117 = vmatpush.msra.mxu1 %v89_v11  ;;  %v166_v14 = vld [vmem:[%s701_s6 + $0x8] sm:$0xff]  ;;  %v165_v16 = vld [vmem:[%s701_s6] sm:$0xff]  ;;  %v244_v57 = vld [vmem:[%s703_s8 + $0x18] sm:$0xff]  ;;  %s381_s28 = sshll.u32 %s495_s27, 4  ;;  %s383_s30 = sshll.u32 %s708_s13, 4  ;;  %s382_s28 = int_to_ptr.vmem [resolvable:$true] %s381_s28  ;;  %s384_s30 = int_to_ptr.hbm [resolvable:$true] %s383_s30 }
   0xc   :  { %188 = vmatpush.msra.mxu2 %v167_v12  ;;  %v428_v17 = vld [vmem:[%s698_s3] ss:$0 sm:$0xff]  ;;  %v243_v58 = vld [vmem:[%s703_s8 + $0x10] sm:$0xff]  ;;  %268 = vmatpush.msrb.mxu0 %v244_v57  ;;  %v242_v59 = vld [vmem:[%s703_s8 + $0x8] sm:$0xff]  ;;  %s496_s15 = smov [#allocation3]   ;;  %s369_s5 = sshll.u32 %s707_s12, 4  ;;  %s370_s5 = int_to_ptr.hbm [resolvable:$true] %s369_s5 }
   0xd   :  { %118 = vmatpush.msra.mxu1 %v88_v13  ;;  %v429_v25 = vld [vmem:[#allocation2] ss:$0 sm:$0xff]  ;;  %v211_v6 = vld [vmem:[%s696_s1 + $0x8] sm:$0xff]  ;;  %v412_v7 = vld [vmem:[%s703_s8 + $0x38] sm:$0xff]  ;;  %s497_s13 = smov 128   ;;  %s498_s0 = smov 8  }
   0xe   :  { %189 = vmatpush.msra.mxu2 %v166_v14  ;;  %269 = vmatpush.msrb.mxu0 %v243_v58  ;;  %v241_v60 = vld [vmem:[%s703_s8] sm:$0xff]  ;;  %v411_v8 = vld [vmem:[%s703_s8 + $0x30] sm:$0xff]  ;;  %v410_v9 = vld [vmem:[%s703_s8 + $0x28] sm:$0xff] }
   0xf   :  { %398 = vmatmul.msk.f32.gmra.mxu0 %vm55_vm0, %v48_v10  ;;  %119 = vmatpush.msra.mxu1 %v87_v15  ;;  %v430_v62 = vld [vmem:[%s702_s7] ss:$0 sm:$0xff]  ;;  %v325_v13 = vld [vmem:[%s705_s10 + $0x18] sm:$0xff]  ;;  %v432_v24 = vld [vmem:[%s704_s9 + $0x1] ss:$0 sm:$0xff]  ;;  %s367_s7 = sshll.u32 %s496_s15, 4  ;;  %s368_s7 = int_to_ptr.vmem [resolvable:$true] %s367_s7 }
  0x10   :  { %190 = vmatpush.msra.mxu2 %v165_v16  ;;  %270 = vmatpush.msrb.mxu0 %v242_v59  ;;  %v210_v5 = vld [vmem:[%s696_s1] sm:$0xff] }
  0x11   :  { %v409_v12 = vld [vmem:[%s703_s8 + $0x20] sm:$0xff]  ;;  %348 = vmatpush.msrb.mxu1 %v325_v13 }
  0x12   :  { %271 = vmatpush.msrb.mxu0 %v241_v60  ;;  %418 = vmatpush.msrb.mxu2 %v325_v13  ;;  %v431_v14 = vld [vmem:[%s704_s9] ss:$0 sm:$0xff] }
  0x84   :  { %v79_v18 = vpop.f32.mrf.mxu0 }
  0x85   :  { %v80_v19 = vadd.f32 %v428_v17, %v79_v18 }
  0x87   :  { %v85_v20 = vmax.f32 %v80_v19, 0.0 }
  0x89   :  { %399 = vmatmul.msk.f32.vlgmr.msra.gmra.mxu1 %vm97_vm1, %v85_v20  ;;  %403 = vmatmul.msk.f32.vlgmr.msra.gmra.mxu2 %vm97_vm1, %v85_v20 }
  0x8c   :  { %v82_v21 = vpop.f32.mrf.mxu0 }
  0x8d   :  { %v83_v22 = vadd.f32 %v428_v17, %v82_v21  ;;  %v324_v21 = vld [vmem:[%s705_s10 + $0x10] sm:$0xff] }
  0x8e   :  { %349 = vmatpush.msrb.mxu1 %v324_v21  ;;  %419 = vmatpush.msrb.mxu2 %v324_v21 }
  0x8f   :  { %v86_v23 = vmax.f32 %v83_v22, 0.0  ;;  %v323_v22 = vld [vmem:[%s705_s10 + $0x8] sm:$0xff] }
  0x90   :  { %350 = vmatpush.msrb.mxu1 %v323_v22  ;;  %420 = vmatpush.msrb.mxu2 %v323_v22 }
  0x91   :  { %400 = vmatmul.msk.f32.gmra.mxu1 %vm97_vm1, %v86_v23  ;;  %404 = vmatmul.msk.f32.gmra.mxu2 %vm97_vm1, %v86_v23  ;;  %v322_v23 = vld [vmem:[%s705_s10] sm:$0xff] }
  0x92   :  { %351 = vmatpush.msrb.mxu1 %v322_v23  ;;  %421 = vmatpush.msrb.mxu2 %v322_v23 }
 0x106   :  { %v121_v26 = vpop.f32.mrf.mxu1 }
 0x107   :  { %v122_v27 = vadd.f32 %v429_v25, %v121_v26 }
 0x109   :  { %v401_v28 = vmul.f32 -1.442695, %v122_v27 }
 0x10b   :  { %434 = vpow2.f32 %v401_v28 }
 0x10c   :  { %v192_v56 = vpop.f32.mrf.mxu2 }
 0x10d   :  { %v193_v2 = vadd.f32 %v430_v62, %v192_v56 }
 0x10e   :  { %v124_v29 = vpop.f32.mrf.mxu1 }
 0x10f   :  { %v125_v30 = vadd.f32 %v429_v25, %v124_v29 }
 0x111   :  { %v435_v31 = vpop.eup %434  ;;  %v402_v32 = vmul.f32 -1.442695, %v125_v30 }
 0x112   :  { %v133_v33 = vadd.f32 1.0, %v435_v31  ;;  %v433_v31 = vld [vmem:[%s706_s11] ss:$0 sm:$0xff] }
 0x113   :  { %436 = vpow2.f32 %v402_v32 }
 0x114   :  { %438 = vrcp.f32 %v133_v33  ;;  %v146_v51 = vand.u32 2147483648, %v133_v33  ;;  %vm140_vm7 = vweird.f32 %v133_v33  ;;  %v144_v52 = vand.u32 2147483647, %v133_v33  ;;  %v195_v61 = vpop.f32.mrf.mxu2 }
 0x115   :  { %v196_v63 = vadd.f32 %v430_v62, %v195_v61 }
 0x116   :  { %v147_v54 = vor.u32 1.1754944e-38, %v146_v51  ;;  %vm145_vm9 = vcmp.eq.f32.partialorder %v144_v52, 8.507059e+37 }
 0x119   :  { %v437_v34 = vpop.eup %436 }
 0x11a   :  { %v134_v35 = vadd.f32 1.0, %v437_v34  ;;  %v439_v36 = vpop.eup %438 }
 0x11b   :  { %v136_v37 = vmul.f32 %v439_v36, %v133_v33  ;;  %vm141_vm6 = vweird.f32 %v439_v36 }
 0x11c   :  { %440 = vrcp.f32 %v134_v35  ;;  %v161_v42 = vand.u32 2147483648, %v134_v35  ;;  %v159_v44 = vand.u32 2147483647, %v134_v35  ;;  %vm155_vm3 = vweird.f32 %v134_v35  ;;  %vm142_vm8 = vmor %vm140_vm7, %vm141_vm6 }
 0x11d   :  { %v137_v41 = vsub.f32 1.0, %v136_v37 }
 0x11e   :  { %v162_v47 = vor.u32 1.1754944e-38, %v161_v42  ;;  %vm160_vm5 = vcmp.eq.f32.partialorder %v159_v44, 8.507059e+37 }
 0x11f   :  { %v138_v46 = vmul.f32 %v439_v36, %v137_v41 }
 0x121   :  { %v139_v50 = vadd.f32 %v439_v36, %v138_v46 }
 0x122   :  { %v441_v38 = vpop.eup %440 }
 0x123   :  { %v151_v39 = vmul.f32 %v441_v38, %v134_v35  ;;  %vm156_vm2 = vweird.f32 %v441_v38  ;;  %v143_v53 = vsel %vm142_vm8, %v439_v36, %v139_v50 }
 0x124   :  { %vm157_vm4 = vmor %vm155_vm3, %vm156_vm2  ;;  %v148_v55 = vsel %vm145_vm9, %v147_v54, %v143_v53 }
 0x125   :  { %v152_v40 = vsub.f32 1.0, %v151_v39 }
 0x127   :  { %v153_v43 = vmul.f32 %v441_v38, %v152_v40 }
 0x129   :  { %v154_v45 = vadd.f32 %v441_v38, %v153_v43 }
 0x12b   :  { %v158_v48 = vsel %vm157_vm4, %v441_v38, %v154_v45 }
 0x12c   :  { %v163_v49 = vsel %vm160_vm5, %v162_v47, %v158_v48 }
 0x12d   :  { %205 = vperm.xlu0 %427, %v163_v49  }
 0x135   :  { %200 = vperm.xlu0 %427, %v148_v55  }
 0x19f   :  { %v206_v0 = vpop.permute.xlu0 %205 }
 0x1a0   :  { %v209_v1 = vmul.f32 %v206_v0, %v196_v63 }
 0x1a2   :  { %232 = vmatpush.msra.mxu3 %v209_v1 }
 0x1a7   :  { %v201_v3 = vpop.permute.xlu0 %200 }
 0x1a8   :  { %v208_v4 = vmul.f32 %v201_v3, %v193_v2 }
 0x1aa   :  { %233 = vmatpush.msra.mxu3 %v208_v4 }
 0x1ab   :  { %405 = vmatmul.msk.f32.vlgmr.msra.gmra.mxu3 %vm55_vm0, %v210_v5 }
 0x1ac   :  { %309 = vmatpush.msrb.mxu3 %v412_v7 }
 0x1ae   :  { %310 = vmatpush.msrb.mxu3 %v411_v8 }
 0x1b0   :  { %311 = vmatpush.msrb.mxu3 %v410_v9 }
 0x1b2   :  { %312 = vmatpush.msrb.mxu3 %v409_v12 }
 0x1b3   :  { %406 = vmatmul.msk.f32.gmra.mxu3 %vm55_vm0, %v211_v6 }
 0x22e   :  { %v235_v10 = vpop.f32.mrf.mxu3 }
 0x22f   :  { %407 = vmatmul.msk.f32.vlgmr.msrb.gmra.mxu0 %vm249_vm10, %v235_v10 }
 0x236   :  { %v238_v11 = vpop.f32.mrf.mxu3 }
 0x237   :  { %362 = vst.msk [vmem:[#allocation5 - $0x6] sm:$0xc0] %vm361_vm11, %v238_v11  ;;  %408 = vmatmul.msk.f32.gmra.mxu0 %vm249_vm10, %v238_v11 }
 0x238   :  { %386 = dma.vmem_to_hbm [thread:$0]  %s382_s28, 32, %s384_s30, [#allocation6]  }
 0x2ac   :  { %v273_v15 = vpop.f32.mrf.mxu0 }
 0x2ad   :  { %v274_v16 = vadd.f32 %v431_v14, %v273_v15 }
 0x2af   :  { %v279_v17 = vmax.f32 %v274_v16, 0.0 }
 0x2b1   :  { %414 = vmatmul.msk.f32.vlgmr.msrb.gmra.mxu3 %vm249_vm10, %v279_v17 }
 0x2b4   :  { %v276_v18 = vpop.f32.mrf.mxu0 }
 0x2b5   :  { %v277_v19 = vadd.f32 %v431_v14, %v276_v18 }
 0x2b7   :  { %v280_v20 = vmax.f32 %v277_v19, 0.0 }
 0x2b9   :  { %415 = vmatmul.msk.f32.gmra.mxu3 %vm249_vm10, %v280_v20 }
 0x334   :  { %v314_v25 = vpop.f32.mrf.mxu3 }
 0x335   :  { %v315_v26 = vadd.f32 %v432_v24, %v314_v25 }
 0x337   :  { %v320_v27 = vmax.f32 %v315_v26, 0.0 }
 0x339   :  { %416 = vmatmul.msk.f32.vlgmr.msrb.gmra.mxu1 %vm249_vm10, %v320_v27 }
 0x33c   :  { %v317_v28 = vpop.f32.mrf.mxu3 }
 0x33d   :  { %v318_v29 = vadd.f32 %v432_v24, %v317_v28 }
 0x33f   :  { %v321_v30 = vmax.f32 %v318_v29, 0.0 }
 0x341   :  { %417 = vmatmul.msk.f32.vlgmr.msrb.gmra.mxu2 %vm249_vm10, %v321_v30 }
 0x3b6   :  { %v353_v32 = vpop.f32.mrf.mxu1 }
 0x3b7   :  { %v354_v33 = vadd.f32 %v433_v31, %v353_v32 }
 0x3b9   :  { %359 = vst.msk [vmem:[#allocation3] sm:$0xff] %vm249_vm10, %v354_v33 }
 0x3c4   :  { %v356_v34 = vpop.f32.mrf.mxu2 }
 0x3c5   :  { %v357_v35 = vadd.f32 %v433_v31, %v356_v34 }
 0x3c7   :  { %360 = vst.msk [vmem:[#allocation3 + $0x8] sm:$0xff] %vm249_vm10, %v357_v35 }
 0x3c8   :  { %375 = dma.vmem_to_hbm [thread:$0]  %s368_s7, 256, %s370_s5, [#allocation4], %s497_s13, %s497_s13, %s498_s0  }
 0x3c9   :  { %490 = dma.done.wait [#allocation4], 256  }
 0x3ca   :  { %491 = vsyncadd [#allocation4], 4294967040 }
 0x3cb   :  { %492 = dma.done.wait [#allocation6], 32  }
 0x3cc   :  { %493 = vsyncadd [#allocation6], 4294967264 }
 0x3cd   :  { %395 = vsyncpa [#allocation4], 1 }
 0x3ce   :  { %396 = vsyncpa [#allocation6], 1 }

</bundles_post_ra>
